<compile_context>
chip_gen: v7x
topology: tpu7x:2x2x1
jax: 0.10.0
libtpu: 0.0.40
codegen_flags: <defaults>
</compile_context>

<pallas_src>
import jax
import jax.numpy as jnp
from jax import lax
from jax.experimental import pallas as pl
from jax.experimental.pallas import tpu as pltpu


# ----------------------------------------------------------------------------
# Fused kernel
# ----------------------------------------------------------------------------
def _make_fused_kernel(H, W, Cin, Cout, Csc, Cob):
    """One grid step = one image.  All arrays are (rows, H*W), HW on lanes."""
    HW = H * W
    Ccat = Cout + Csc
    f32, bf16 = jnp.float32, jnp.bfloat16

    # full-res offset (u-1), u = 0..3  ->  (parity phase p, half-res shift q)
    PQ = [((u + 1) % 2, (u - 1 - ((u + 1) % 2)) // 2) for u in range(4)]

    def kernel(x_ref, sc_ref, wd_ref, wb_ref, bd_ref, bb_ref, o_ref,
               rd_ref, rb_ref):
        # ---- lane-coordinate masks (replace zero-padded halo buffers) -------
        lane = lax.broadcasted_iota(jnp.int32, (1, HW), 1)
        if (W & (W - 1)) == 0:
            col = jnp.bitwise_and(lane, W - 1)
        else:
            col = lax.rem(lane, W)
        row_ok = {-1: lane >= W, 0: None, 1: lane < (H - 1) * W}
        col_ok = {-1: col >= 1, 0: None, 1: col <= W - 2}

        def shifted(a, ry, rx):
            """a[:, i*W+j] -> a[:, (i+ry)*W+(j+rx)], zero outside the image."""
            s = ry * W + rx
            out = pltpu.roll(a, (-s) % HW, 1) if s % HW else a     # XLU rotate
            m, c = row_ok[ry], col_ok[rx]
            m = c if m is None else (m if c is None else jnp.logical_and(m, c))
            return out if m is None else jnp.where(m, out, 0.0)

        # ---- deconv im2col: 9 shifted copies of x, taps stacked on sublanes -
        xf = x_ref[0].astype(f32)                                   # (Cin, HW)
        for dy in range(3):
            for dx in range(3):
                t = dy * 3 + dx
                rd_ref[t * Cin:(t + 1) * Cin, :] = shifted(xf, dy - 1, dx - 1)

        # ---- ConvTranspose2d(4, stride=2, pad=1): ONE MXU matmul ------------
        # subpixel decomposition; row m = (py*2+px)*Cout + cout, lane = i*W+j
        ydec = jnp.dot(wd_ref[...], rd_ref[...].astype(bf16),
                       preferred_element_type=f32) + bd_ref[...]    # (4*Cout,HW)

        # ---- channel concat([y, shortcut]) per output parity phase ----------
        scf = sc_ref[0].astype(f32)                                 # (4*Csc, HW)
        phs = [jnp.concatenate([ydec[p * Cout:(p + 1) * Cout, :],
                                scf[p * Csc:(p + 1) * Csc, :]], axis=0)
               for p in range(4)]                                   # 4 x (Ccat,HW)

        # ---- block-conv im2col: 16 full-res offsets x (Cout+Csc) channels ---
        for uy in range(4):
            py, qy = PQ[uy]
            for ux in range(4):
                px, qx = PQ[ux]
                t = uy * 4 + ux
                rb_ref[t * Ccat:(t + 1) * Ccat, :] = shifted(
                    phs[py * 2 + px], qy, qx)

        # ---- 3x3 conv + bias + ReLU: ONE MXU matmul, K = 16*(Cout+Csc) ------
        acc = jnp.dot(wb_ref[...], rb_ref[...].astype(bf16),
                      preferred_element_type=f32) + bb_ref[...]     # (4*Cob, HW)
        o_ref[0] = jnp.maximum(acc, 0.0).astype(o_ref.dtype)        # lane-dense

    return kernel


# ----------------------------------------------------------------------------
# Weight re-packing (tiny, runs once inside the jitted wrapper)
# ----------------------------------------------------------------------------
def _prepare_weights(params, Cin, Cout, Csc, Cob, cdt):
    f32 = jnp.float32
    # --- deconv: PyTorch ConvTranspose2d weight (Cin, Cout, 4, 4) ------------
    # out phase (py,px) at half-res (i,j) = sum_{dy,dx in 0..2, cin}
    #   x[cin, i+dy-1, j+dx-1] * W[cin, cout, 3-2*dy+py, 3-2*dx+px]  (if valid)
    w = params["deconv_w"]
    zero_d = jnp.zeros((Cin, Cout), w.dtype)
    rows = []
    for dy in range(3):
        for dx in range(3):
            cols = []
            for py in range(2):
                for px in range(2):
                    ky, kx = 3 - 2 * dy + py, 3 - 2 * dx + px
                    cols.append(w[:, :, ky, kx]
                                if 0 <= ky <= 3 and 0 <= kx <= 3 else zero_d)
            rows.append(jnp.concatenate(cols, axis=1))       # (Cin, 4*Cout)
    wd = jnp.concatenate(rows, axis=0).T.astype(cdt)          # (4*Cout, 9*Cin)

    # --- block conv: PyTorch Conv2d weight (Cob, Cout+Csc, 3, 3) -------------
    # K packed per full-res offset t=(uy,ux): [Cout y-channels ; Csc sc-channels]
    wb = params["block_w"]
    Ccat = Cout + Csc
    zero_b = jnp.zeros((Ccat, Cob), wb.dtype)
    rows = []
    for uy in range(4):
        for ux in range(4):
            cols = []
            for py in range(2):
                for px in range(2):
                    ry, rx = uy - py, ux - px                 # 3x3 tap index
                    cols.append(wb[:, :, ry, rx].T
                                if 0 <= ry <= 2 and 0 <= rx <= 2 else zero_b)
            rows.append(jnp.concatenate(cols, axis=1))        # (Ccat, 4*Cob)
    wball = jnp.concatenate(rows, axis=0).T.astype(cdt)       # (4*Cob, 16*Ccat)

    bd = jnp.tile(params["deconv_b"], 4).reshape(4 * Cout, 1).astype(f32)
    bb = jnp.tile(params["block_b"], 4).reshape(4 * Cob, 1).astype(f32)
    return wd, wball, bd, bb


# ----------------------------------------------------------------------------
# Wrapper
# ----------------------------------------------------------------------------
@jax.jit
def decoder_block_forward(x_nchw, shortcut_nchw, params):
    N, Cin, H, W = x_nchw.shape
    _, Csc, OH, OW = shortcut_nchw.shape
    Cout = params["deconv_w"].shape[1]
    Cob = params["block_w"].shape[0]
    Ccat = Cout + Csc
    HW = H * W
    cdt = jnp.bfloat16

    # NCHW -> (N, Cin, H*W): contiguous reshape, no relayout pass.
    x2 = x_nchw.reshape(N, Cin, HW).astype(cdt)
    # shortcut: split the 4 output parity phases onto the channel axis.
    # row (py*2+px)*Csc + c  holds  shortcut[c, 2i+py, 2j+px] at lane i*W+j.
    scp = jnp.transpose(shortcut_nchw.reshape(N, Csc, H, 2, W, 2),
                        (0, 3, 5, 1, 2, 4)).reshape(N, 4 * Csc, HW).astype(cdt)
    # TODO(synk): this phase split (and the output merge below) could move into
    #             the kernel via strided pl.ds reads to save one HBM pass.

    wd, wball, bd, bb = _prepare_weights(params, Cin, Cout, Csc, Cob, cdt)
    kernel = _make_fused_kernel(H, W, Cin, Cout, Csc, Cob)

    out = pl.pallas_call(
        kernel,
        out_shape=jax.ShapeDtypeStruct((N, 4 * Cob, HW), jnp.float32),
        grid=(N,),
        in_specs=[
            pl.BlockSpec((1, Cin, HW), lambda n: (n, 0, 0)),
            pl.BlockSpec((1, 4 * Csc, HW), lambda n: (n, 0, 0)),
            pl.BlockSpec((4 * Cout, 9 * Cin), lambda n: (0, 0)),
            pl.BlockSpec((4 * Cob, 16 * Ccat), lambda n: (0, 0)),
            pl.BlockSpec((4 * Cout, 1), lambda n: (0, 0)),
            pl.BlockSpec((4 * Cob, 1), lambda n: (0, 0)),
        ],
        out_specs=pl.BlockSpec((1, 4 * Cob, HW), lambda n: (n, 0, 0)),
        scratch_shapes=[
            pltpu.VMEM((9 * Cin, HW), jnp.float32),       # deconv im2col
            pltpu.VMEM((16 * Ccat, HW), jnp.float32),     # block-conv im2col
        ],
        compiler_params=pltpu.CompilerParams(
            dimension_semantics=("parallel",),
            vmem_limit_bytes=32 * 1024 * 1024),
    )(x2, scp, wd, wball, bd, bb)

    # parity-phase merge fused with the NCHW restore (one small XLA transpose)
    out = out.reshape(N, 2, 2, Cob, H, W)
    out = jnp.transpose(out, (0, 3, 4, 1, 5, 2)).reshape(N, Cob, OH, OW)
    return out


# ----------------------------------------------------------------------------
# Independent XLA reference (f32, HIGHEST precision) for validation
# ----------------------------------------------------------------------------
def _reference(x_nchw, shortcut_nchw, params):
    x = jnp.transpose(x_nchw, (0, 2, 3, 1))
    sc = jnp.transpose(shortcut_nchw, (0, 2, 3, 1))
    wt = params["deconv_w"]
    w_deconv = jnp.transpose(wt[:, :, ::-1, ::-1], (2, 3, 0, 1))
    y = lax.conv_general_dilated(
        x, w_deconv, window_strides=(1, 1), padding=[(2, 2), (2, 2)],
        lhs_dilation=(2, 2), dimension_numbers=("NHWC", "HWIO", "NHWC"),
        precision=lax.Precision.HIGHEST,
    ) + params["deconv_b"]
    cat = jnp.concatenate([y, sc], axis=-1)
    w_block = jnp.transpose(params["block_w"], (2, 3, 1, 0))
    out = lax.conv_general_dilated(
        cat, w_block, window_strides=(1, 1), padding=[(1, 1), (1, 1)],
        dimension_numbers=("NHWC", "HWIO", "NHWC"),
        precision=lax.Precision.HIGHEST,
    ) + params["block_b"]
    out = jax.nn.relu(out)
    return jnp.transpose(out, (0, 3, 1, 2))


if __name__ == "__main__":
    key = jax.random.PRNGKey(0)
    N, Cin, H, W = 2, 8, 16, 16     # decoder input (NCHW)
    Cout = 4                        # deconv out channels (= block out channels)
    Csc = 4                         # shortcut channels
    OH, OW = 2 * H, 2 * W

    k0, k1, k2, k3, k4, k5 = jax.random.split(key, 6)
    x = jax.random.normal(k0, (N, Cin, H, W), jnp.float32)
    shortcut = jax.random.normal(k1, (N, Csc, OH, OW), jnp.float32)

    params = {
        # ConvTranspose2d weight layout: (in_channels, out_channels, kH, kW)
        "deconv_w": jax.random.normal(k2, (Cin, Cout, 4, 4), jnp.float32) * 0.1,
        "deconv_b": jax.random.normal(k3, (Cout,), jnp.float32) * 0.1,
        # block_unit Conv2d weight layout: (out_channels, in_channels, kH, kW)
        "block_w": jax.random.normal(k4, (Cout, Cout + Csc, 3, 3), jnp.float32) * 0.1,
        "block_b": jax.random.normal(k5, (Cout,), jnp.float32) * 0.1,
    }

    out = jax.block_until_ready(decoder_block_forward(x, shortcut, params))
    assert out.shape == (N, Cout, OH, OW), out.shape

    ref = jax.block_until_ready(_reference(x, shortcut, params))
    max_err = float(jnp.max(jnp.abs(out - ref)))
    # bf16 MXU operands with f32 accumulation -> relaxed tolerance vs f32 reference
    assert jnp.allclose(out, ref, atol=5e-2, rtol=5e-2), f"max_err={max_err}"

    print("KERNEL_OK")
</pallas_src>

<mosaic_0001>
module attributes {stable_mosaic.version = 11 : i64} {
  func.func @kernel(%arg0: i32, %arg1: memref<1x8x256xbf16, #tpu.memory_space<vmem>>, %arg2: memref<1x16x256xbf16, #tpu.memory_space<vmem>>, %arg3: memref<16x72xbf16, #tpu.memory_space<vmem>>, %arg4: memref<16x128xbf16, #tpu.memory_space<vmem>>, %arg5: memref<16x1xf32, #tpu.memory_space<vmem>>, %arg6: memref<16x1xf32, #tpu.memory_space<vmem>>, %arg7: memref<1x16x256xf32, #tpu.memory_space<vmem>>, %arg8: memref<72x256xf32, #tpu.memory_space<vmem>>, %arg9: memref<128x256xf32, #tpu.memory_space<vmem>>) attributes {dimension_semantics = [#tpu.dimension_semantics<parallel>], iteration_bounds = array<i64: 2>, scalar_prefetch = 0 : i64, scratch_operands = 2 : i64, tpu.core_type = #tpu.core_type<tc>, window_params = [{transform_indices = @transform_0, window_bounds = array<i64: 1, 8, 256>}, {transform_indices = @transform_1, window_bounds = array<i64: 1, 16, 256>}, {pipeline_mode = #tpu.pipeline_mode<synchronous>, transform_indices = @transform_2, window_bounds = array<i64: 16, 72>}, {pipeline_mode = #tpu.pipeline_mode<synchronous>, transform_indices = @transform_3, window_bounds = array<i64: 16, 128>}, {pipeline_mode = #tpu.pipeline_mode<synchronous>, transform_indices = @transform_4, window_bounds = array<i64: 16, 1>}, {pipeline_mode = #tpu.pipeline_mode<synchronous>, transform_indices = @transform_5, window_bounds = array<i64: 16, 1>}, {transform_indices = @transform_6, window_bounds = array<i64: 1, 16, 256>}]} {
    %0 = tpu.iota {dimensions = array<i32: 1>} : vector<1x256xi32>
    %c15_i32 = arith.constant 15 : i32
    %1 = vector.broadcast %c15_i32 : i32 to vector<1x256xi32>
    %2 = arith.andi %0, %1 : vector<1x256xi32>
    %c16_i32 = arith.constant 16 : i32
    %3 = vector.broadcast %c16_i32 : i32 to vector<1x256xi32>
    %4 = arith.cmpi sge, %0, %3 : vector<1x256xi32>
    %c240_i32 = arith.constant 240 : i32
    %5 = vector.broadcast %c240_i32 : i32 to vector<1x256xi32>
    %6 = arith.cmpi slt, %0, %5 : vector<1x256xi32>
    %c1_i32 = arith.constant 1 : i32
    %7 = vector.broadcast %c1_i32 : i32 to vector<1x256xi32>
    %8 = arith.cmpi sge, %2, %7 : vector<1x256xi32>
    %c14_i32 = arith.constant 14 : i32
    %9 = vector.broadcast %c14_i32 : i32 to vector<1x256xi32>
    %10 = arith.cmpi sle, %2, %9 : vector<1x256xi32>
    %c0 = arith.constant 0 : index
    %c0_0 = arith.constant 0 : index
    %c0_1 = arith.constant 0 : index
    %11 = vector.load %arg1[%c0, %c0_0, %c0_1] : memref<1x8x256xbf16, #tpu.memory_space<vmem>>, vector<1x8x256xbf16>
    %12 = vector.shape_cast %11 : vector<1x8x256xbf16> to vector<8x256xbf16>
    %13 = arith.extf %12 : vector<8x256xbf16> to vector<8x256xf32>
    %c17_i32 = arith.constant 17 : i32
    %14 = tpu.dynamic_rotate %13 by %c17_i32 dim 1 : vector<8x256xf32>, i32 -> vector<8x256xf32>
    %15 = arith.andi %4, %8 : vector<1x256xi1>
    %cst = arith.constant 0.000000e+00 : f32
    %16 = vector.shape_cast %15 : vector<1x256xi1> to vector<1x256xi1>
    %17 = vector.broadcast %16 : vector<1x256xi1> to vector<8x256xi1>
    %18 = vector.broadcast %cst : f32 to vector<8x256xf32>
    %19 = arith.select %17, %14, %18 : vector<8x256xi1>, vector<8x256xf32>
    %c0_2 = arith.constant 0 : index
    %c0_3 = arith.constant 0 : index
    %20 = vector.load %arg8[%c0_2, %c0_3] : memref<72x256xf32, #tpu.memory_space<vmem>>, vector<8x256xf32>
    tpu.vector_store %arg8[%c0_2, %c0_3], %19 {strides = array<i32>} : memref<72x256xf32, #tpu.memory_space<vmem>>, vector<8x256xf32>,
    %c16_i32_4 = arith.constant 16 : i32
    %21 = tpu.dynamic_rotate %13 by %c16_i32_4 dim 1 : vector<8x256xf32>, i32 -> vector<8x256xf32>
    %cst_5 = arith.constant 0.000000e+00 : f32
    %22 = vector.shape_cast %4 : vector<1x256xi1> to vector<1x256xi1>
    %23 = vector.broadcast %22 : vector<1x256xi1> to vector<8x256xi1>
    %24 = vector.broadcast %cst_5 : f32 to vector<8x256xf32>
    %25 = arith.select %23, %21, %24 : vector<8x256xi1>, vector<8x256xf32>
    %c8 = arith.constant 8 : index
    %c0_6 = arith.constant 0 : index
    %26 = vector.load %arg8[%c8, %c0_6] : memref<72x256xf32, #tpu.memory_space<vmem>>, vector<8x256xf32>
    tpu.vector_store %arg8[%c8, %c0_6], %25 {strides = array<i32>} : memref<72x256xf32, #tpu.memory_space<vmem>>, vector<8x256xf32>,
    %c15_i32_7 = arith.constant 15 : i32
    %27 = tpu.dynamic_rotate %13 by %c15_i32_7 dim 1 : vector<8x256xf32>, i32 -> vector<8x256xf32>
    %28 = arith.andi %4, %10 : vector<1x256xi1>
    %cst_8 = arith.constant 0.000000e+00 : f32
    %29 = vector.shape_cast %28 : vector<1x256xi1> to vector<1x256xi1>
    %30 = vector.broadcast %29 : vector<1x256xi1> to vector<8x256xi1>
    %31 = vector.broadcast %cst_8 : f32 to vector<8x256xf32>
    %32 = arith.select %30, %27, %31 : vector<8x256xi1>, vector<8x256xf32>
    %c16 = arith.constant 16 : index
    %c0_9 = arith.constant 0 : index
    %33 = vector.load %arg8[%c16, %c0_9] : memref<72x256xf32, #tpu.memory_space<vmem>>, vector<8x256xf32>
    tpu.vector_store %arg8[%c16, %c0_9], %32 {strides = array<i32>} : memref<72x256xf32, #tpu.memory_space<vmem>>, vector<8x256xf32>,
    %c1_i32_10 = arith.constant 1 : i32
    %34 = tpu.dynamic_rotate %13 by %c1_i32_10 dim 1 : vector<8x256xf32>, i32 -> vector<8x256xf32>
    %cst_11 = arith.constant 0.000000e+00 : f32
    %35 = vector.shape_cast %8 : vector<1x256xi1> to vector<1x256xi1>
    %36 = vector.broadcast %35 : vector<1x256xi1> to vector<8x256xi1>
    %37 = vector.broadcast %cst_11 : f32 to vector<8x256xf32>
    %38 = arith.select %36, %34, %37 : vector<8x256xi1>, vector<8x256xf32>
    %c24 = arith.constant 24 : index
    %c0_12 = arith.constant 0 : index
    %39 = vector.load %arg8[%c24, %c0_12] : memref<72x256xf32, #tpu.memory_space<vmem>>, vector<8x256xf32>
    tpu.vector_store %arg8[%c24, %c0_12], %38 {strides = array<i32>} : memref<72x256xf32, #tpu.memory_space<vmem>>, vector<8x256xf32>,
    %c32 = arith.constant 32 : index
    %c0_13 = arith.constant 0 : index
    %40 = vector.load %arg8[%c32, %c0_13] : memref<72x256xf32, #tpu.memory_space<vmem>>, vector<8x256xf32>
    tpu.vector_store %arg8[%c32, %c0_13], %13 {strides = array<i32>} : memref<72x256xf32, #tpu.memory_space<vmem>>, vector<8x256xf32>,
    %c255_i32 = arith.constant 255 : i32
    %41 = tpu.dynamic_rotate %13 by %c255_i32 dim 1 : vector<8x256xf32>, i32 -> vector<8x256xf32>
    %cst_14 = arith.constant 0.000000e+00 : f32
    %42 = vector.shape_cast %10 : vector<1x256xi1> to vector<1x256xi1>
    %43 = vector.broadcast %42 : vector<1x256xi1> to vector<8x256xi1>
    %44 = vector.broadcast %cst_14 : f32 to vector<8x256xf32>
    %45 = arith.select %43, %41, %44 : vector<8x256xi1>, vector<8x256xf32>
    %c40 = arith.constant 40 : index
    %c0_15 = arith.constant 0 : index
    %46 = vector.load %arg8[%c40, %c0_15] : memref<72x256xf32, #tpu.memory_space<vmem>>, vector<8x256xf32>
    tpu.vector_store %arg8[%c40, %c0_15], %45 {strides = array<i32>} : memref<72x256xf32, #tpu.memory_space<vmem>>, vector<8x256xf32>,
    %c241_i32 = arith.constant 241 : i32
    %47 = tpu.dynamic_rotate %13 by %c241_i32 dim 1 : vector<8x256xf32>, i32 -> vector<8x256xf32>
    %48 = arith.andi %6, %8 : vector<1x256xi1>
    %cst_16 = arith.constant 0.000000e+00 : f32
    %49 = vector.shape_cast %48 : vector<1x256xi1> to vector<1x256xi1>
    %50 = vector.broadcast %49 : vector<1x256xi1> to vector<8x256xi1>
    %51 = vector.broadcast %cst_16 : f32 to vector<8x256xf32>
    %52 = arith.select %50, %47, %51 : vector<8x256xi1>, vector<8x256xf32>
    %c48 = arith.constant 48 : index
    %c0_17 = arith.constant 0 : index
    %53 = vector.load %arg8[%c48, %c0_17] : memref<72x256xf32, #tpu.memory_space<vmem>>, vector<8x256xf32>
    tpu.vector_store %arg8[%c48, %c0_17], %52 {strides = array<i32>} : memref<72x256xf32, #tpu.memory_space<vmem>>, vector<8x256xf32>,
    %c240_i32_18 = arith.constant 240 : i32
    %54 = tpu.dynamic_rotate %13 by %c240_i32_18 dim 1 : vector<8x256xf32>, i32 -> vector<8x256xf32>
    %cst_19 = arith.constant 0.000000e+00 : f32
    %55 = vector.shape_cast %6 : vector<1x256xi1> to vector<1x256xi1>
    %56 = vector.broadcast %55 : vector<1x256xi1> to vector<8x256xi1>
    %57 = vector.broadcast %cst_19 : f32 to vector<8x256xf32>
    %58 = arith.select %56, %54, %57 : vector<8x256xi1>, vector<8x256xf32>
    %c56 = arith.constant 56 : index
    %c0_20 = arith.constant 0 : index
    %59 = vector.load %arg8[%c56, %c0_20] : memref<72x256xf32, #tpu.memory_space<vmem>>, vector<8x256xf32>
    tpu.vector_store %arg8[%c56, %c0_20], %58 {strides = array<i32>} : memref<72x256xf32, #tpu.memory_space<vmem>>, vector<8x256xf32>,
    %c239_i32 = arith.constant 239 : i32
    %60 = tpu.dynamic_rotate %13 by %c239_i32 dim 1 : vector<8x256xf32>, i32 -> vector<8x256xf32>
    %61 = arith.andi %6, %10 : vector<1x256xi1>
    %cst_21 = arith.constant 0.000000e+00 : f32
    %62 = vector.shape_cast %61 : vector<1x256xi1> to vector<1x256xi1>
    %63 = vector.broadcast %62 : vector<1x256xi1> to vector<8x256xi1>
    %64 = vector.broadcast %cst_21 : f32 to vector<8x256xf32>
    %65 = arith.select %63, %60, %64 : vector<8x256xi1>, vector<8x256xf32>
    %c64 = arith.constant 64 : index
    %c0_22 = arith.constant 0 : index
    %66 = vector.load %arg8[%c64, %c0_22] : memref<72x256xf32, #tpu.memory_space<vmem>>, vector<8x256xf32>
    tpu.vector_store %arg8[%c64, %c0_22], %65 {strides = array<i32>} : memref<72x256xf32, #tpu.memory_space<vmem>>, vector<8x256xf32>,
    %c0_23 = arith.constant 0 : index
    %c0_24 = arith.constant 0 : index
    %67 = vector.load %arg3[%c0_23, %c0_24] : memref<16x72xbf16, #tpu.memory_space<vmem>>, vector<16x72xbf16>
    %c0_25 = arith.constant 0 : index
    %c0_26 = arith.constant 0 : index
    %68 = vector.load %arg8[%c0_25, %c0_26] : memref<72x256xf32, #tpu.memory_space<vmem>>, vector<72x256xf32>
    %69 = arith.truncf %68 : vector<72x256xf32> to vector<72x256xbf16>
    %cst_27 = arith.constant dense<0.000000e+00> : vector<16x256xf32>
    %70 = tpu.matmul %67, %69, %cst_27 {dimension_numbers = #tpu.dot_dimension_numbers<[1], [0], [0], [1], [0, 0, 1, 1], [], []>} : vector<16x72xbf16>, vector<72x256xbf16>, vector<16x256xf32> -> vector<16x256xf32>
    %c0_28 = arith.constant 0 : index
    %c0_29 = arith.constant 0 : index
    %71 = vector.load %arg5[%c0_28, %c0_29] : memref<16x1xf32, #tpu.memory_space<vmem>>, vector<16x1xf32>
    %72 = vector.broadcast %71 : vector<16x1xf32> to vector<16x256xf32>
    %73 = arith.addf %70, %72 : vector<16x256xf32>
    %c0_30 = arith.constant 0 : index
    %c0_31 = arith.constant 0 : index
    %c0_32 = arith.constant 0 : index
    %74 = vector.load %arg2[%c0_30, %c0_31, %c0_32] : memref<1x16x256xbf16, #tpu.memory_space<vmem>>, vector<1x16x256xbf16>
    %75 = vector.shape_cast %74 : vector<1x16x256xbf16> to vector<16x256xbf16>
    %76 = arith.extf %75 : vector<16x256xbf16> to vector<16x256xf32>
    %77 = vector.extract_strided_slice %73 {offsets = [0, 0], sizes = [4, 256], strides = [1, 1]} : vector<16x256xf32> to vector<4x256xf32>
    %78 = vector.extract_strided_slice %76 {offsets = [0, 0], sizes = [4, 256], strides = [1, 1]} : vector<16x256xf32> to vector<4x256xf32>
    %79 = tpu.concatenate %77, %78 in 0 : vector<4x256xf32>, vector<4x256xf32> -> vector<8x256xf32>
    %80 = vector.extract_strided_slice %73 {offsets = [4, 0], sizes = [4, 256], strides = [1, 1]} : vector<16x256xf32> to vector<4x256xf32>
    %81 = vector.extract_strided_slice %76 {offsets = [4, 0], sizes = [4, 256], strides = [1, 1]} : vector<16x256xf32> to vector<4x256xf32>
    %82 = tpu.concatenate %80, %81 in 0 : vector<4x256xf32>, vector<4x256xf32> -> vector<8x256xf32>
    %83 = vector.extract_strided_slice %73 {offsets = [8, 0], sizes = [4, 256], strides = [1, 1]} : vector<16x256xf32> to vector<4x256xf32>
    %84 = vector.extract_strided_slice %76 {offsets = [8, 0], sizes = [4, 256], strides = [1, 1]} : vector<16x256xf32> to vector<4x256xf32>
    %85 = tpu.concatenate %83, %84 in 0 : vector<4x256xf32>, vector<4x256xf32> -> vector<8x256xf32>
    %86 = vector.extract_strided_slice %73 {offsets = [12, 0], sizes = [4, 256], strides = [1, 1]} : vector<16x256xf32> to vector<4x256xf32>
    %87 = vector.extract_strided_slice %76 {offsets = [12, 0], sizes = [4, 256], strides = [1, 1]} : vector<16x256xf32> to vector<4x256xf32>
    %88 = tpu.concatenate %86, %87 in 0 : vector<4x256xf32>, vector<4x256xf32> -> vector<8x256xf32>
    %c17_i32_33 = arith.constant 17 : i32
    %89 = tpu.dynamic_rotate %88 by %c17_i32_33 dim 1 : vector<8x256xf32>, i32 -> vector<8x256xf32>
    %90 = arith.andi %4, %8 : vector<1x256xi1>
    %cst_34 = arith.constant 0.000000e+00 : f32
    %91 = vector.shape_cast %90 : vector<1x256xi1> to vector<1x256xi1>
    %92 = vector.broadcast %91 : vector<1x256xi1> to vector<8x256xi1>
    %93 = vector.broadcast %cst_34 : f32 to vector<8x256xf32>
    %94 = arith.select %92, %89, %93 : vector<8x256xi1>, vector<8x256xf32>
    %c0_35 = arith.constant 0 : index
    %c0_36 = arith.constant 0 : index
    %95 = vector.load %arg9[%c0_35, %c0_36] : memref<128x256xf32, #tpu.memory_space<vmem>>, vector<8x256xf32>
    tpu.vector_store %arg9[%c0_35, %c0_36], %94 {strides = array<i32>} : memref<128x256xf32, #tpu.memory_space<vmem>>, vector<8x256xf32>,
    %c16_i32_37 = arith.constant 16 : i32
    %96 = tpu.dynamic_rotate %85 by %c16_i32_37 dim 1 : vector<8x256xf32>, i32 -> vector<8x256xf32>
    %cst_38 = arith.constant 0.000000e+00 : f32
    %97 = vector.shape_cast %4 : vector<1x256xi1> to vector<1x256xi1>
    %98 = vector.broadcast %97 : vector<1x256xi1> to vector<8x256xi1>
    %99 = vector.broadcast %cst_38 : f32 to vector<8x256xf32>
    %100 = arith.select %98, %96, %99 : vector<8x256xi1>, vector<8x256xf32>
    %c8_39 = arith.constant 8 : index
    %c0_40 = arith.constant 0 : index
    %101 = vector.load %arg9[%c8_39, %c0_40] : memref<128x256xf32, #tpu.memory_space<vmem>>, vector<8x256xf32>
    tpu.vector_store %arg9[%c8_39, %c0_40], %100 {strides = array<i32>} : memref<128x256xf32, #tpu.memory_space<vmem>>, vector<8x256xf32>,
    %c16_i32_41 = arith.constant 16 : i32
    %102 = tpu.dynamic_rotate %88 by %c16_i32_41 dim 1 : vector<8x256xf32>, i32 -> vector<8x256xf32>
    %cst_42 = arith.constant 0.000000e+00 : f32
    %103 = vector.shape_cast %4 : vector<1x256xi1> to vector<1x256xi1>
    %104 = vector.broadcast %103 : vector<1x256xi1> to vector<8x256xi1>
    %105 = vector.broadcast %cst_42 : f32 to vector<8x256xf32>
    %106 = arith.select %104, %102, %105 : vector<8x256xi1>, vector<8x256xf32>
    %c16_43 = arith.constant 16 : index
    %c0_44 = arith.constant 0 : index
    %107 = vector.load %arg9[%c16_43, %c0_44] : memref<128x256xf32, #tpu.memory_space<vmem>>, vector<8x256xf32>
    tpu.vector_store %arg9[%c16_43, %c0_44], %106 {strides = array<i32>} : memref<128x256xf32, #tpu.memory_space<vmem>>, vector<8x256xf32>,
    %c15_i32_45 = arith.constant 15 : i32
    %108 = tpu.dynamic_rotate %85 by %c15_i32_45 dim 1 : vector<8x256xf32>, i32 -> vector<8x256xf32>
    %109 = arith.andi %4, %10 : vector<1x256xi1>
    %cst_46 = arith.constant 0.000000e+00 : f32
    %110 = vector.shape_cast %109 : vector<1x256xi1> to vector<1x256xi1>
    %111 = vector.broadcast %110 : vector<1x256xi1> to vector<8x256xi1>
    %112 = vector.broadcast %cst_46 : f32 to vector<8x256xf32>
    %113 = arith.select %111, %108, %112 : vector<8x256xi1>, vector<8x256xf32>
    %c24_47 = arith.constant 24 : index
    %c0_48 = arith.constant 0 : index
    %114 = vector.load %arg9[%c24_47, %c0_48] : memref<128x256xf32, #tpu.memory_space<vmem>>, vector<8x256xf32>
    tpu.vector_store %arg9[%c24_47, %c0_48], %113 {strides = array<i32>} : memref<128x256xf32, #tpu.memory_space<vmem>>, vector<8x256xf32>,
    %c1_i32_49 = arith.constant 1 : i32
    %115 = tpu.dynamic_rotate %82 by %c1_i32_49 dim 1 : vector<8x256xf32>, i32 -> vector<8x256xf32>
    %cst_50 = arith.constant 0.000000e+00 : f32
    %116 = vector.shape_cast %8 : vector<1x256xi1> to vector<1x256xi1>
    %117 = vector.broadcast %116 : vector<1x256xi1> to vector<8x256xi1>
    %118 = vector.broadcast %cst_50 : f32 to vector<8x256xf32>
    %119 = arith.select %117, %115, %118 : vector<8x256xi1>, vector<8x256xf32>
    %c32_51 = arith.constant 32 : index
    %c0_52 = arith.constant 0 : index
    %120 = vector.load %arg9[%c32_51, %c0_52] : memref<128x256xf32, #tpu.memory_space<vmem>>, vector<8x256xf32>
    tpu.vector_store %arg9[%c32_51, %c0_52], %119 {strides = array<i32>} : memref<128x256xf32, #tpu.memory_space<vmem>>, vector<8x256xf32>,
    %c40_53 = arith.constant 40 : index
    %c0_54 = arith.constant 0 : index
    %121 = vector.load %arg9[%c40_53, %c0_54] : memref<128x256xf32, #tpu.memory_space<vmem>>, vector<8x256xf32>
    tpu.vector_store %arg9[%c40_53, %c0_54], %79 {strides = array<i32>} : memref<128x256xf32, #tpu.memory_space<vmem>>, vector<8x256xf32>,
    %c48_55 = arith.constant 48 : index
    %c0_56 = arith.constant 0 : index
    %122 = vector.load %arg9[%c48_55, %c0_56] : memref<128x256xf32, #tpu.memory_space<vmem>>, vector<8x256xf32>
    tpu.vector_store %arg9[%c48_55, %c0_56], %82 {strides = array<i32>} : memref<128x256xf32, #tpu.memory_space<vmem>>, vector<8x256xf32>,
    %c255_i32_57 = arith.constant 255 : i32
    %123 = tpu.dynamic_rotate %79 by %c255_i32_57 dim 1 : vector<8x256xf32>, i32 -> vector<8x256xf32>
    %cst_58 = arith.constant 0.000000e+00 : f32
    %124 = vector.shape_cast %10 : vector<1x256xi1> to vector<1x256xi1>
    %125 = vector.broadcast %124 : vector<1x256xi1> to vector<8x256xi1>
    %126 = vector.broadcast %cst_58 : f32 to vector<8x256xf32>
    %127 = arith.select %125, %123, %126 : vector<8x256xi1>, vector<8x256xf32>
    %c56_59 = arith.constant 56 : index
    %c0_60 = arith.constant 0 : index
    %128 = vector.load %arg9[%c56_59, %c0_60] : memref<128x256xf32, #tpu.memory_space<vmem>>, vector<8x256xf32>
    tpu.vector_store %arg9[%c56_59, %c0_60], %127 {strides = array<i32>} : memref<128x256xf32, #tpu.memory_space<vmem>>, vector<8x256xf32>,
    %c1_i32_61 = arith.constant 1 : i32
    %129 = tpu.dynamic_rotate %88 by %c1_i32_61 dim 1 : vector<8x256xf32>, i32 -> vector<8x256xf32>
    %cst_62 = arith.constant 0.000000e+00 : f32
    %130 = vector.shape_cast %8 : vector<1x256xi1> to vector<1x256xi1>
    %131 = vector.broadcast %130 : vector<1x256xi1> to vector<8x256xi1>
    %132 = vector.broadcast %cst_62 : f32 to vector<8x256xf32>
    %133 = arith.select %131, %129, %132 : vector<8x256xi1>, vector<8x256xf32>
    %c64_63 = arith.constant 64 : index
    %c0_64 = arith.constant 0 : index
    %134 = vector.load %arg9[%c64_63, %c0_64] : memref<128x256xf32, #tpu.memory_space<vmem>>, vector<8x256xf32>
    tpu.vector_store %arg9[%c64_63, %c0_64], %133 {strides = array<i32>} : memref<128x256xf32, #tpu.memory_space<vmem>>, vector<8x256xf32>,
    %c72 = arith.constant 72 : index
    %c0_65 = arith.constant 0 : index
    %135 = vector.load %arg9[%c72, %c0_65] : memref<128x256xf32, #tpu.memory_space<vmem>>, vector<8x256xf32>
    tpu.vector_store %arg9[%c72, %c0_65], %85 {strides = array<i32>} : memref<128x256xf32, #tpu.memory_space<vmem>>, vector<8x256xf32>,
    %c80 = arith.constant 80 : index
    %c0_66 = arith.constant 0 : index
    %136 = vector.load %arg9[%c80, %c0_66] : memref<128x256xf32, #tpu.memory_space<vmem>>, vector<8x256xf32>
    tpu.vector_store %arg9[%c80, %c0_66], %88 {strides = array<i32>} : memref<128x256xf32, #tpu.memory_space<vmem>>, vector<8x256xf32>,
    %c255_i32_67 = arith.constant 255 : i32
    %137 = tpu.dynamic_rotate %85 by %c255_i32_67 dim 1 : vector<8x256xf32>, i32 -> vector<8x256xf32>
    %cst_68 = arith.constant 0.000000e+00 : f32
    %138 = vector.shape_cast %10 : vector<1x256xi1> to vector<1x256xi1>
    %139 = vector.broadcast %138 : vector<1x256xi1> to vector<8x256xi1>
    %140 = vector.broadcast %cst_68 : f32 to vector<8x256xf32>
    %141 = arith.select %139, %137, %140 : vector<8x256xi1>, vector<8x256xf32>
    %c88 = arith.constant 88 : index
    %c0_69 = arith.constant 0 : index
    %142 = vector.load %arg9[%c88, %c0_69] : memref<128x256xf32, #tpu.memory_space<vmem>>, vector<8x256xf32>
    tpu.vector_store %arg9[%c88, %c0_69], %141 {strides = array<i32>} : memref<128x256xf32, #tpu.memory_space<vmem>>, vector<8x256xf32>,
    %c241_i32_70 = arith.constant 241 : i32
    %143 = tpu.dynamic_rotate %82 by %c241_i32_70 dim 1 : vector<8x256xf32>, i32 -> vector<8x256xf32>
    %144 = arith.andi %6, %8 : vector<1x256xi1>
    %cst_71 = arith.constant 0.000000e+00 : f32
    %145 = vector.shape_cast %144 : vector<1x256xi1> to vector<1x256xi1>
    %146 = vector.broadcast %145 : vector<1x256xi1> to vector<8x256xi1>
    %147 = vector.broadcast %cst_71 : f32 to vector<8x256xf32>
    %148 = arith.select %146, %143, %147 : vector<8x256xi1>, vector<8x256xf32>
    %c96 = arith.constant 96 : index
    %c0_72 = arith.constant 0 : index
    %149 = vector.load %arg9[%c96, %c0_72] : memref<128x256xf32, #tpu.memory_space<vmem>>, vector<8x256xf32>
    tpu.vector_store %arg9[%c96, %c0_72], %148 {strides = array<i32>} : memref<128x256xf32, #tpu.memory_space<vmem>>, vector<8x256xf32>,
    %c240_i32_73 = arith.constant 240 : i32
    %150 = tpu.dynamic_rotate %79 by %c240_i32_73 dim 1 : vector<8x256xf32>, i32 -> vector<8x256xf32>
    %cst_74 = arith.constant 0.000000e+00 : f32
    %151 = vector.shape_cast %6 : vector<1x256xi1> to vector<1x256xi1>
    %152 = vector.broadcast %151 : vector<1x256xi1> to vector<8x256xi1>
    %153 = vector.broadcast %cst_74 : f32 to vector<8x256xf32>
    %154 = arith.select %152, %150, %153 : vector<8x256xi1>, vector<8x256xf32>
    %c104 = arith.constant 104 : index
    %c0_75 = arith.constant 0 : index
    %155 = vector.load %arg9[%c104, %c0_75] : memref<128x256xf32, #tpu.memory_space<vmem>>, vector<8x256xf32>
    tpu.vector_store %arg9[%c104, %c0_75], %154 {strides = array<i32>} : memref<128x256xf32, #tpu.memory_space<vmem>>, vector<8x256xf32>,
    %c240_i32_76 = arith.constant 240 : i32
    %156 = tpu.dynamic_rotate %82 by %c240_i32_76 dim 1 : vector<8x256xf32>, i32 -> vector<8x256xf32>
    %cst_77 = arith.constant 0.000000e+00 : f32
    %157 = vector.shape_cast %6 : vector<1x256xi1> to vector<1x256xi1>
    %158 = vector.broadcast %157 : vector<1x256xi1> to vector<8x256xi1>
    %159 = vector.broadcast %cst_77 : f32 to vector<8x256xf32>
    %160 = arith.select %158, %156, %159 : vector<8x256xi1>, vector<8x256xf32>
    %c112 = arith.constant 112 : index
    %c0_78 = arith.constant 0 : index
    %161 = vector.load %arg9[%c112, %c0_78] : memref<128x256xf32, #tpu.memory_space<vmem>>, vector<8x256xf32>
    tpu.vector_store %arg9[%c112, %c0_78], %160 {strides = array<i32>} : memref<128x256xf32, #tpu.memory_space<vmem>>, vector<8x256xf32>,
    %c239_i32_79 = arith.constant 239 : i32
    %162 = tpu.dynamic_rotate %79 by %c239_i32_79 dim 1 : vector<8x256xf32>, i32 -> vector<8x256xf32>
    %163 = arith.andi %6, %10 : vector<1x256xi1>
    %cst_80 = arith.constant 0.000000e+00 : f32
    %164 = vector.shape_cast %163 : vector<1x256xi1> to vector<1x256xi1>
    %165 = vector.broadcast %164 : vector<1x256xi1> to vector<8x256xi1>
    %166 = vector.broadcast %cst_80 : f32 to vector<8x256xf32>
    %167 = arith.select %165, %162, %166 : vector<8x256xi1>, vector<8x256xf32>
    %c120 = arith.constant 120 : index
    %c0_81 = arith.constant 0 : index
    %168 = vector.load %arg9[%c120, %c0_81] : memref<128x256xf32, #tpu.memory_space<vmem>>, vector<8x256xf32>
    tpu.vector_store %arg9[%c120, %c0_81], %167 {strides = array<i32>} : memref<128x256xf32, #tpu.memory_space<vmem>>, vector<8x256xf32>,
    %c0_82 = arith.constant 0 : index
    %c0_83 = arith.constant 0 : index
    %169 = vector.load %arg4[%c0_82, %c0_83] : memref<16x128xbf16, #tpu.memory_space<vmem>>, vector<16x128xbf16>
    %c0_84 = arith.constant 0 : index
    %c0_85 = arith.constant 0 : index
    %170 = vector.load %arg9[%c0_84, %c0_85] : memref<128x256xf32, #tpu.memory_space<vmem>>, vector<128x256xf32>
    %171 = arith.truncf %170 : vector<128x256xf32> to vector<128x256xbf16>
    %cst_86 = arith.constant dense<0.000000e+00> : vector<16x256xf32>
    %172 = tpu.matmul %169, %171, %cst_86 {dimension_numbers = #tpu.dot_dimension_numbers<[1], [0], [0], [1], [0, 0, 1, 1], [], []>} : vector<16x128xbf16>, vector<128x256xbf16>, vector<16x256xf32> -> vector<16x256xf32>
    %c0_87 = arith.constant 0 : index
    %c0_88 = arith.constant 0 : index
    %173 = vector.load %arg6[%c0_87, %c0_88] : memref<16x1xf32, #tpu.memory_space<vmem>>, vector<16x1xf32>
    %174 = vector.broadcast %173 : vector<16x1xf32> to vector<16x256xf32>
    %175 = arith.addf %172, %174 : vector<16x256xf32>
    %cst_89 = arith.constant 0.000000e+00 : f32
    %176 = vector.broadcast %cst_89 : f32 to vector<16x256xf32>
    %177 = arith.maximumf %175, %176 : vector<16x256xf32>
    %c0_90 = arith.constant 0 : index
    %c0_91 = arith.constant 0 : index
    %c0_92 = arith.constant 0 : index
    %178 = vector.load %arg7[%c0_90, %c0_91, %c0_92] : memref<1x16x256xf32, #tpu.memory_space<vmem>>, vector<1x16x256xf32>
    %179 = vector.shape_cast %178 : vector<1x16x256xf32> to vector<16x256xf32>
    %180 = vector.shape_cast %177 : vector<16x256xf32> to vector<1x16x256xf32>
    tpu.vector_store %arg7[%c0_90, %c0_91, %c0_92], %180 {strides = array<i32>} : memref<1x16x256xf32, #tpu.memory_space<vmem>>, vector<1x16x256xf32>,
    return
  }
  func.func @transform_0(%arg0: i32) -> (i32, i32, i32) {
    %c0_i32 = arith.constant 0 : i32
    %c0_i32_0 = arith.constant 0 : i32
    %c0_i32_1 = arith.constant 0 : i32
    return %arg0, %c0_i32, %c0_i32_0 : i32, i32, i32
  }
  func.func @transform_1(%arg0: i32) -> (i32, i32, i32) {
    %c0_i32 = arith.constant 0 : i32
    %c0_i32_0 = arith.constant 0 : i32
    %c0_i32_1 = arith.constant 0 : i32
    return %arg0, %c0_i32, %c0_i32_0 : i32, i32, i32
  }
  func.func @transform_2(%arg0: i32) -> (i32, i32) {
    %c0_i32 = arith.constant 0 : i32
    %c0_i32_0 = arith.constant 0 : i32
    %c0_i32_1 = arith.constant 0 : i32
    return %c0_i32, %c0_i32_0 : i32, i32
  }
  func.func @transform_3(%arg0: i32) -> (i32, i32) {
    %c0_i32 = arith.constant 0 : i32
    %c0_i32_0 = arith.constant 0 : i32
    %c0_i32_1 = arith.constant 0 : i32
    return %c0_i32, %c0_i32_0 : i32, i32
  }
  func.func @transform_4(%arg0: i32) -> (i32, i32) {
    %c0_i32 = arith.constant 0 : i32
    %c0_i32_0 = arith.constant 0 : i32
    %c0_i32_1 = arith.constant 0 : i32
    return %c0_i32, %c0_i32_0 : i32, i32
  }
  func.func @transform_5(%arg0: i32) -> (i32, i32) {
    %c0_i32 = arith.constant 0 : i32
    %c0_i32_0 = arith.constant 0 : i32
    %c0_i32_1 = arith.constant 0 : i32
    return %c0_i32, %c0_i32_0 : i32, i32
  }
  func.func @transform_6(%arg0: i32) -> (i32, i32, i32) {
    %c0_i32 = arith.constant 0 : i32
    %c0_i32_0 = arith.constant 0 : i32
    %c0_i32_1 = arith.constant 0 : i32
    return %arg0, %c0_i32, %c0_i32_0 : i32, i32, i32
  }
}

</mosaic_0001>

<bundles_post_ra>
// kernel: tile.0
= control target key start
LH: loop header
LB: loop body
LE: loop exit
PB: predicated region body
PF: predicated region fallthrough
CT: control target
= control target key end

     0   :  { %s34_s8 = smov 125   ;;  %vm7_vm0 = vcmask 7168   ;;  %s35_s11 = smov 126   ;;  %s61_s0 = inlined_call_operand.vmem [shape: f32[4,4], index: 0, kind: input, shape index: {}]   ;;  %s62_s1 = inlined_call_operand.vmem [shape: f32[16,1], index: 1, kind: output, shape index: {}]  }
   0x1   :  { %v4_v0 = vld [vmem:[%s61_s0] sm:$0xf]  ;;  %s33_s0 = smov 127  }
   0x2   :  { %5 = vst [vmem:[#allocation0] sm:$0xf] %v4_v0 }
   0x9   :  { %v9_v1 = vld [vmem:[#allocation0] sm:$0xf]  }
   0xa   :  { %v21_v2 = vld [vmem:[#allocation0] sm:$0xf]   ;;  %10 = vrot.lane.b32.xlu0 %v9_v1, %s33_s0 }
   0xb   :  { %22 = vrot.lane.b32.xlu1 %v21_v2, %s34_s8  ;;  %v6_v3 = vld [vmem:[#allocation0] sm:$0xf]  }
   0xc   :  { %v15_v4 = vld [vmem:[#allocation0] sm:$0xf]   ;;  %8 = vst.msk [vmem:[%s62_s1] ss:$4 sm:$0xf] %vm7_vm0, %v6_v3  }
   0xe   :  { %16 = vrot.lane.b32.xlu0 %v15_v4, %s35_s11 }
  0x7c   :  { %v11_v5 = vpop.permute.xlu0 %10  }
  0x7d   :  { %v23_v6 = vpop.permute.xlu1 %22   ;;  %27 = vst.msk [vmem:[%s62_s1 + $0x1] ss:$4 sm:$0xf] %vm7_vm0, %v11_v5  }
  0x7e   :  { %29 = vst.msk [vmem:[%s62_s1 + $0x3] ss:$4 sm:$0xf] %vm7_vm0, %v23_v6  }
  0x80   :  { %v17_v7 = vpop.permute.xlu0 %16  }
  0x81   :  { %28 = vst.msk [vmem:[%s62_s1 + $0x2] ss:$4 sm:$0xf] %vm7_vm0, %v17_v7  }

// kernel: tile.18
= control target key start
LH: loop header
LB: loop body
LE: loop exit
PB: predicated region body
PF: predicated region fallthrough
CT: control target
= control target key end

     0   :  { %2 = vsyncpa [#allocation1], 0  ;;  %s44_s6 = smov [#allocation0]   ;;  %s70_s0 = inlined_call_operand.hbm [shape: f32[4], index: 0, kind: input, shape index: {}]   ;;  %s71_s1 = inlined_call_operand.vmem [shape: f32[4,4], index: 1, kind: output, shape index: {}]  }
   0x1   :  { %s9_s7 = sshll.u32 %s44_s6, 4  ;;  %s20_s10 = scalar_lea.hbm %s70_s0, 16  ;;  %s10_s7 = int_to_ptr.vmem [resolvable:$true] %s9_s7 }
   0x2   :  { %p21_p0 = scmp.ne.s32.totalorder %s70_s0, %s20_s10  ;;  %p24_p1 = scmp.lt.u32.totalorder %s20_s10, %s70_s0 }
   0x4   :  { %p26_p2 = pnand %p24_p1, %p21_p0 }
   0x6   :  { %29 = shalt.err (!%p26_p2)
}
   0x7   :  { %s30_s15 = scalar_lea.vmem %s10_s7, 16  ;;  %s34_s16 = scalar_lea.vmem %s10_s7, 32 }
   0x8   :  { %p31_p3 = scmp.ne.s32.totalorder %s10_s7, %s30_s15  ;;  %p35_p4 = scmp.lt.s32.totalorder %s10_s7, %s10_s7 }
   0x9   :  { %p36_p5 = scmp.lt.s32.totalorder %s34_s16, %s30_s15 }
   0xb   :  { %p37_p6 = por %p36_p5, %p35_p4 }
   0xd   :  { %p38_p7 = pnand %p37_p6, %p31_p3 }
   0xf   :  { %41 = shalt.err (!%p38_p7)
}
  0x10   :  { %12 = dma.hbm_to_vmem [thread:$0]  %s70_s0, 16, %s10_s7, [#allocation1]  }
  0x11   :  { %42 = dma.done.wait [#allocation1], 16  }
  0x12   :  { %43 = vsyncadd [#allocation1], 4294967280  ;;  %v16_v0 = vld [vmem:[#allocation0] ss:$0 sm:$0xff] }
  0x13   :  { %17 = vst [vmem:[%s71_s1] sm:$0xf] %v16_v0 }
  0x14   :  { %18 = vsyncpa [#allocation1], 1 }

// kernel: tile.13
= control target key start
LH: loop header
LB: loop body
LE: loop exit
PB: predicated region body
PF: predicated region fallthrough
CT: control target
= control target key end

     0   :  { %s22_s0 = inlined_call_operand.vmem [shape: f32[4], index: 0, kind: input, shape index: {}]   ;;  %s23_s1 = inlined_call_operand.vmem [shape: f32[4,4], index: 1, kind: output, shape index: {}]  }
   0x1   :  { %v4_v0 = vld [vmem:[%s22_s0] ss:$0 sm:$0xff] }
   0x2   :  { %5 = vst [vmem:[%s23_s1] sm:$0xf] %v4_v0 }

// kernel: decoder_block_forward.1
= control target key start
LH: loop header
LB: loop body
LE: loop exit
PB: predicated region body
PF: predicated region fallthrough
CT: control target
= control target key end

     0   :  { %s1139_s21 = smov 0   ;;  %s1504_s0 = inlined_call_operand.vmem [shape: bf16[2,8,256], index: 0, kind: input, shape index: {}]   ;;  %s1505_s1 = inlined_call_operand.vmem [shape: bf16[2,16,256], index: 1, kind: input, shape index: {}]   ;;  %s1506_s2 = inlined_call_operand.vmem [shape: bf16[16,72], index: 2, kind: input, shape index: {}]   ;;  %s1507_s3 = inlined_call_operand.vmem [shape: bf16[16,128], index: 3, kind: input, shape index: {}]   ;;  %s1508_s4 = inlined_call_operand.vmem [shape: f32[16,1], index: 4, kind: input, shape index: {}]   ;;  %s1509_s5 = inlined_call_operand.vmem [shape: f32[16,1], index: 5, kind: input, shape index: {}]   ;;  %s1510_s6 = inlined_call_operand.vmem [shape: f32[2,16,256], index: 6, kind: output, shape index: {}]  }
   0x1 LB: > { %s872_s22 = sadd.s32 4294967295, %s1092_s21   ;;  %p876_p0 = scmp.ge.s32.totalorder %s1092_s21, 1  ;;  %s1092_s21 = sphi %s1139_s21, %s16_s21  }
   0x2   : > { %p222_p1 = scmp.lt.s32.totalorder %s1092_s21, 3 }
   0x4   : > { %p223_p2 = pnand %p876_p0, %p222_p1 }
   0x5   : > { %p257_p3 = scmp.lt.s32.totalorder (!%p223_p2), %s872_s22, 1  ;;  %s1094_s27 = smov (!%p223_p2), 15   ;;  %v1102_v4 = vmov (!%p223_p2), 0   ;;  %v449_v5 = vld [vmem:[%s1508_s4] sm:$0xff] (!%p223_p2)  ;;  %v450_v6 = vld [vmem:[%s1508_s4 + $0x8] sm:$0xff] (!%p223_p2)  ;;  %v273_v7 = vlaneseq (!%p223_p2)  ;;  %vm1103_vm10 = vmmov (!%p223_p2), 1  }
   0x6   : > { %226 = sbr.rel (%p223_p2) target bundleno = 759 (0x2f7), region = 44  ;;  %s1095_s28 = smov (!%p223_p2), 17   ;;  %509 = vmatprep.mubr.bf16.mxu0 (!%p223_p2), %v1102_v4  ;;  %1023 = vset.pattern.permute.xlu1 (!%p223_p2), %v1102_v4  ;;  %v1084_v14 = vld [vmem:[%s1506_s2] sm:$0xff] (!%p223_p2)  }
   0x7   : > { %s1096_s29 = smov (!%p223_p2), 1   ;;  %s1097_s30 = smov (!%p223_p2), 16   ;;  %1022 = vset.pattern.permute.xlu0 (!%p223_p2), %v1102_v4  ;;  %786 = vmatprep.mubr.bf16.mxu1 (!%p223_p2), %v1102_v4  ;;  %v1175_v8 = vand.u32 (!%p223_p2), 127, %v273_v7 }
   0x8   : > { %s1098_s7 = smov (!%p223_p2), 127   ;;  %s1099_s8 = smov (!%p223_p2), 113  }
   0x9   : > { %s1100_s9 = smov (!%p223_p2), 112   ;;  %s1101_s10 = smov (!%p223_p2), 111   ;;  %v1178_v9 = vadd.s32 (!%p223_p2), 128, %v1175_v8  ;;  %v276_v10 = vand.u32 (!%p223_p2), 15, %v1175_v8  ;;  %vm1512_vm0 = vcmp.ge.s32.totalorder (!%p223_p2), %v1175_v8, 16  ;;  %vm1513_vm2 = vcmp.lt.s32.totalorder (!%p223_p2), %v1175_v8, 15 }
   0xa   : > { %vm1514_vm4 = vcmp.lt.s32.totalorder (!%p223_p2), %v1175_v8, 17  ;;  %vm1511_vm5 = vcmp.lt.s32.totalorder (!%p223_p2), %v1175_v8, 1  ;;  %vm1515_vm6 = vcmp.lt.s32.totalorder (!%p223_p2), %v1175_v8, 16  ;;  %vm1516_vm7 = vcmp.lt.s32.totalorder (!%p223_p2), %v1175_v8, 127 }
   0xb   : > { %v277_v11 = vand.u32 (!%p223_p2), 15, %v1178_v9  ;;  %vm1183_vm1 = vcmp.ge.s32.totalorder (!%p223_p2), %v276_v10, 1  ;;  %vm1204_vm9 = vcmp.le.s32.totalorder (!%p223_p2), %v276_v10, 14  ;;  %vm374_vm13 = vcmp.lt.s32.totalorder (!%p223_p2), %v1175_v8, 113 }
   0xc   : > { %vm1200_vm8 = vmand (!%p223_p2), %vm1512_vm0, %vm1183_vm1 }
   0xd   : > { %s1562_s22 = smov (!%p257_p3, %s872_s22), 1  ;;  %vm1188_vm3 = vcmp.ge.s32.totalorder %v277_v11, 1  ;;  %vm1219_vm12 = vcmp.le.s32.totalorder %v277_v11, 14  ;;  %vm1236_vm14 = vmpackc.low %vm1512_vm0, %vm1200_vm8 }
   0xe   : > { %s889_s23 = sshll.u32 %s1562_s22, 3  ;;  %vm1215_vm11 = vmpackc.low %vm1103_vm10, %vm1188_vm3  ;;  %s890_s17 = sshll.u32 %s1562_s22, 4 }
   0xf   : > { %s261_s26 = scalar_lea.vmem %s1504_s0, %s889_s23  ;;  %vm1248_vm15 = vmand %vm1512_vm0, %vm1204_vm9  ;;  %s266_s20 = scalar_lea.vmem %s1505_s1, %s890_s17 }
  0x10   : > { %v1153_v0 = vld [vmem:[%s261_s26] sm:$0xff]  ;;  %vm898_vm8 = vmpackc.low %vm1188_vm3, %vm1219_vm12 }
  0x11   : > { %v287_v1 = vunpack.c.l.bf16 %v1153_v0  ;;  %v288_v2 = vunpack.c.h.bf16 %v1153_v0  ;;  %vm901_vm0 = vmpackc.low %vm1183_vm1, %vm1248_vm15  ;;  %v520_v22 = vld [vmem:[%s266_s20] sm:$0xff] }
  0x12   : > { %v522_v31 = vunpack.c.l.bf16 %v520_v22 }
  0x13   : > { %v992_v3 = vpack.i.bf16 %v288_v2, %v287_v1 }
  0x15   : > { %993 = vrot.lane.b32.xlu1 %v992_v3, %s1094_s27  ;;  %983 = vrot.lane.b32.xlu0 %v992_v3, %s1095_s28 }
  0x19   : > { %998 = vrot.lane.b32.xlu1 %v992_v3, %s1096_s29  ;;  %988 = vrot.lane.b32.xlu0 %v992_v3, %s1097_s30 }
  0x1d   : > { %1003 = vrot.lane.b32.xlu0 %v992_v3, %s1098_s7  ;;  %1008 = vrot.lane.b32.xlu1 %v992_v3, %s1099_s8 }
  0x21   : > { %1013 = vrot.lane.b32.xlu0 %v992_v3, %s1100_s9  ;;  %1018 = vrot.lane.b32.xlu1 %v992_v3, %s1101_s10 }
  0x25   : > { %453 = vperm.xlu1 %1023, %v449_v5   ;;  %458 = vperm.xlu0 %1022, %v450_v6  }
  0x87   : > { %v994_v12 = vpop.permute.xlu1 %993  ;;  %v984_v13 = vpop.permute.xlu0 %983 }
  0x88   : > { %v996_v15 = vunpack.i.h.bf16 %v994_v12  ;;  %v995_v16 = vunpack.i.l.bf16 %v994_v12  ;;  %v986_v17 = vunpack.i.h.bf16 %v984_v13  ;;  %v985_v18 = vunpack.i.l.bf16 %v984_v13 }
  0x8a   : > { %v326_v28 = vsel %vm1513_vm2, %v995_v16, %v996_v15  ;;  %v294_v29 = vsel %vm1514_vm4, %v985_v18, %v986_v17  ;;  %v295_v34 = vsel %vm1514_vm4, %v986_v17, %v985_v18  ;;  %v327_v37 = vsel %vm1513_vm2, %v996_v15, %v995_v16  ;;  %v521_v17 = vld [vmem:[%s266_s20 + $0x8] sm:$0xff] }
  0x8b   : > { %v999_v20 = vpop.permute.xlu1 %998  ;;  %v989_v21 = vpop.permute.xlu0 %988  ;;  %vm1517_vm2 = vcmp.lt.s32.totalorder %v1178_v9, 240  ;;  %vm406_vm4 = vcmp.lt.s32.totalorder %v1175_v8, 111  ;;  %v524_v18 = vunpack.c.l.bf16 %v521_v17  ;;  %v525_v19 = vunpack.c.h.bf16 %v521_v17 }
  0x8c   : > { %v1001_v24 = vunpack.i.h.bf16 %v999_v20  ;;  %v1000_v25 = vunpack.i.l.bf16 %v999_v20  ;;  %v991_v26 = vunpack.i.h.bf16 %v989_v21  ;;  %v990_v27 = vunpack.i.l.bf16 %v989_v21 }
  0x8e   : > { %v343_v32 = vsel %vm1511_vm5, %v1000_v25, %v1001_v24  ;;  %v311_v33 = vsel %vm1515_vm6, %v990_v27, %v991_v26  ;;  %v312_v35 = vsel %vm1515_vm6, %v991_v26, %v990_v27  ;;  %v344_v38 = vsel %vm1511_vm5, %v1001_v24, %v1000_v25  ;;  %vm1278_vm6 = vmpackc.low %vm1219_vm12, %vm1103_vm10 }
  0x8f   : > { %v893_v39 = vpack.c.bf16 %v311_v33, %v294_v29  ;;  %v1004_v40 = vpop.permute.xlu0 %1003  ;;  %v896_v41 = vpack.c.bf16 %v312_v35, %v295_v34  ;;  %v1009_v42 = vpop.permute.xlu1 %1008  ;;  %v899_v48 = vpack.c.bf16 %v343_v32, %v326_v28  ;;  %vm391_vm5 = vcmp.lt.s32.totalorder %v1175_v8, 112 }
  0x90   : > { %v1006_v44 = vunpack.i.h.bf16 %v1004_v40  ;;  %v1005_v45 = vunpack.i.l.bf16 %v1004_v40  ;;  %v1011_v46 = vunpack.i.h.bf16 %v1009_v42  ;;  %v1010_v47 = vunpack.i.l.bf16 %v1009_v42 }
  0x91   : > { %894 = vmatprep.subr.msk.bf16.mxu0 %vm1215_vm11, %v893_v39  ;;  %v902_v50 = vpack.c.bf16 %v344_v38, %v327_v37  ;;  %v544_v24 = vrot.slane %v524_v18, 4  ;;  %v545_v26 = vrot.slane %v525_v19, 4  ;;  %v523_v32 = vunpack.c.h.bf16 %v520_v22 }
  0x92   : > { %v361_v49 = vsel %vm1516_vm7, %v1006_v44, %v1005_v45  ;;  %897 = vmatpush1.bf16.msk.msra.mxu0 %vm1236_vm14, %v896_v41  ;;  %v360_v51 = vsel %vm1516_vm7, %v1005_v45, %v1006_v44  ;;  %v376_v53 = vsel %vm374_vm13, %v1011_v46, %v1010_v47  ;;  %vm1286_vm7 = vmand %vm1517_vm2, %vm1219_vm12  ;;  %v375_v7 = vsel %vm374_vm13, %v1010_v47, %v1011_v46 }
  0x93   : > { %v905_v52 = vpack.c.bf16 %v361_v49, %v288_v2  ;;  %900 = vmatprep.subr.msk.bf16.mxu0 %vm898_vm8, %v899_v48  ;;  %v1014_v54 = vpop.permute.xlu0 %1013  ;;  %v1019_v56 = vpop.permute.xlu1 %1018  ;;  %vm378_vm8 = vmand %vm1517_vm2, %vm1188_vm3  ;;  %v908_v62 = vpack.c.bf16 %v360_v51, %v287_v1  ;;  %v528_v44 = vrot.slane %v522_v31, 4  ;;  %v529_v45 = vrot.slane %v523_v32, 4 }
  0x94   : > { %v1016_v57 = vunpack.i.h.bf16 %v1014_v54  ;;  %v1015_v58 = vunpack.i.l.bf16 %v1014_v54  ;;  %v1021_v60 = vunpack.i.h.bf16 %v1019_v56  ;;  %v1020_v61 = vunpack.i.l.bf16 %v1019_v56  ;;  %vm1312_vm3 = vmpackc.low %vm1204_vm9, %vm1103_vm10 }
  0x95   : > { %vm1337_vm12 = vmpackc.low %vm1103_vm10, %vm1183_vm1  ;;  %vm466_vm1 = vcmask 588800   ;;  %vm1544_vm10 = vcmp.lt.s32.totalorder %v1175_v8, 16 }
  0x96   : > { %v393_v63 = vsel %vm391_vm5, %v1016_v57, %v1015_v58  ;;  %903 = vmatpush1.bf16.msk.msra.mxu0 %vm901_vm0, %v902_v50  ;;  %v408_v2 = vsel %vm406_vm4, %v1021_v60, %v1020_v61  ;;  %v407_v3 = vsel %vm406_vm4, %v1020_v61, %v1021_v60  ;;  %vm1320_vm0 = vmpackc.low %vm1517_vm2, %vm378_vm8  ;;  %v392_v10 = vsel %vm391_vm5, %v1015_v58, %v1016_v57  ;;  %v737_v57 = vld [vmem:[%s1509_s5 + $0x8] sm:$0xff]  ;;  %v736_v58 = vld [vmem:[%s1509_s5] sm:$0xff] }
  0x97   : > { %v911_v4 = vpack.c.bf16 %v393_v63, %v376_v53  ;;  %906 = vmatprep.subr.msk.bf16.mxu0 %vm1278_vm6, %v905_v52  ;;  %v416_v1 = vsel %vm1286_vm7, %v408_v2, 0.0  ;;  %v415_v6 = vsel %vm1204_vm9, %v407_v3, 0.0  ;;  %v914_v15 = vpack.c.bf16 %v392_v10, %v375_v7  ;;  %vm1545_vm8 = vmmov %vm1544_vm10 }
  0x98   : > { %v448_v12 = vpack.c.bf16 %v416_v1, %v416_v1  ;;  %v447_v13 = vpack.c.bf16 %v415_v6, %v415_v6  ;;  %vm470_vm9 = vcmask 1043456   ;;  %vm1548_vm2 = vcmp.lt.s32.totalorder %v1175_v8, 15 }
  0x9a   : > { %909 = vmatpush1.bf16.msk.msra.mxu0 %vm1312_vm3, %v908_v62  ;;  %v472_v16 = vsel %vm470_vm9, %v447_v13, 0 }
  0x9b   : > { %912 = vmatprep.subr.msk.bf16.mxu0 %vm1320_vm0, %v911_v4 }
  0x9e   : > { %915 = vmatpush1.bf16.msk.msra.mxu0 %vm1337_vm12, %v914_v15 }
  0x9f   : > { %884 = vmatprep.subr.msk.bf16.mxu0 %vm470_vm9, %v448_v12 }
  0xa2   : > { %486 = vmatpush1.bf16.msra.mxu0 %v472_v16 }
  0xa4   : > { %v459_v21 = vpop.permute.xlu0 %458  ;;  %v454_v27 = vpop.permute.xlu1 %453 }
  0xa5   : > { %885 = vmatmul.mubr.msk.bf16.vlgmr.msra.gmra.mrb[0].mxu0 %vm466_vm1, %v1084_v14 }
 0x178   : > { %v511_v20 = vpop.f32.mrb[0].mxu0 }
 0x179   : > { %v513_v23 = vpop.f32.mrb[1].mxu0  ;;  %v512_v37 = vadd.f32 %v511_v20, %v454_v27 }
 0x17a   : > { %v515_v25 = vpop.f32.mrb[2].mxu0  ;;  %v514_v38 = vadd.f32 %v513_v23, %v454_v27 }
 0x17b   : > { %v516_v28 = vadd.f32 %v515_v25, %v459_v21  ;;  %v517_v29 = vpop.f32.mrb[3].mxu0  ;;  %v536_v48 = vrot.slane %v512_v37, 4  ;;  %v1371_v50 = vsel %vm470_vm9, %v512_v37, %v528_v44 }
 0x17c   : > { %v518_v33 = vadd.f32 %v517_v29, %v459_v21  ;;  %v537_v49 = vrot.slane %v514_v38, 4  ;;  %v1374_v51 = vsel %vm470_vm9, %v514_v38, %v529_v45 }
 0x17d   : > { %v1353_v34 = vsel %vm470_vm9, %v516_v28, %v544_v24  ;;  %v552_v35 = vrot.slane %v516_v28, 4  ;;  %v1378_v52 = vsel %vm470_vm9, %v536_v48, %v522_v31  ;;  %v1049_v54 = vpack.i.bf16 %v1374_v51, %v1371_v50 }
 0x17e   : > { %v1356_v39 = vsel %vm470_vm9, %v518_v33, %v545_v26  ;;  %v553_v40 = vrot.slane %v518_v33, 4  ;;  %v1381_v53 = vsel %vm470_vm9, %v537_v49, %v523_v32 }
 0x17f   : > { %v1359_v41 = vsel %vm470_vm9, %v552_v35, %v524_v18  ;;  %v1024_v42 = vpack.i.bf16 %v1356_v39, %v1353_v34  ;;  %v1044_v56 = vpack.i.bf16 %v1381_v53, %v1378_v52 }
 0x180   : > { %v1364_v46 = vsel %vm470_vm9, %v553_v40, %v525_v19  ;;  %vm1546_vm9 = vcmp.lt.s32.totalorder %v1175_v8, 17 }
 0x181   : > { %1025 = vrot.lane.b32.xlu0 %v1024_v42, %s1097_s30  ;;  %v1034_v47 = vpack.i.bf16 %v1364_v46, %v1359_v41  ;;  %vm1547_vm1 = vmmov %vm1546_vm9 }
 0x183   : > { %1035 = vrot.lane.b32.xlu1 %v1034_v47, %s1095_s28 }
 0x185   : > { %1030 = vrot.lane.b32.xlu0 %v1024_v42, %s1094_s27 }
 0x187   : > { %1040 = vrot.lane.b32.xlu1 %v1034_v47, %s1097_s30 }
 0x189   : > { %1050 = vrot.lane.b32.xlu0 %v1049_v54, %s1098_s7 }
 0x18b   : > { %1045 = vrot.lane.b32.xlu1 %v1044_v56, %s1096_s29 }
 0x18d   : > { %1060 = vrot.lane.b32.xlu0 %v1024_v42, %s1098_s7 }
 0x18f   : > { %1055 = vrot.lane.b32.xlu1 %v1034_v47, %s1096_s29  ;;  %s891_s29 = sshll.u32 %s1562_s22, 5 }
 0x191   : > { %1070 = vrot.lane.b32.xlu0 %v1049_v54, %s1100_s9 }
 0x193   : > { %1065 = vrot.lane.b32.xlu1 %v1044_v56, %s1099_s8  ;;  %s271_s8 = scalar_lea.vmem %s1510_s6, %s891_s29 }
 0x195   : > { %1080 = vrot.lane.b32.xlu0 %v1049_v54, %s1101_s10 }
 0x197   : > { %1075 = vrot.lane.b32.xlu1 %v1044_v56, %s1100_s9 }
 0x199   : > { %745 = vperm.xlu0 %1022, %v737_v57  }
 0x19b   : > { %740 = vperm.xlu1 %1023, %v736_v58  }
 0x1f3   : > { %v1026_v60 = vpop.permute.xlu0 %1025 }
 0x1f4   : > { %v1028_v61 = vunpack.i.h.bf16 %v1026_v60  ;;  %v1027_v62 = vunpack.i.l.bf16 %v1026_v60 }
 0x1f5   : > { %v1036_v63 = vpop.permute.xlu1 %1035 }
 0x1f6   : > { %v1038_v2 = vunpack.i.h.bf16 %v1036_v63  ;;  %v1037_v3 = vunpack.i.l.bf16 %v1036_v63  ;;  %v572_v1 = vsel %vm1544_vm10, %v1027_v62, %v1028_v61  ;;  %v573_v6 = vsel %vm1545_vm8, %v1028_v61, %v1027_v62  ;;  %vm1549_vm10 = vmmov %vm1548_vm2 }
 0x1f7   : > { %v1031_v4 = vpop.permute.xlu0 %1030 }
 0x1f8   : > { %v1033_v7 = vunpack.i.h.bf16 %v1031_v4  ;;  %v1032_v10 = vunpack.i.l.bf16 %v1031_v4  ;;  %v562_v12 = vsel %vm1546_vm9, %v1037_v3, %v1038_v2  ;;  %v563_v13 = vsel %vm1547_vm1, %v1038_v2, %v1037_v3  ;;  %vm1550_vm9 = vmmov %vm1545_vm8 }
 0x1f9   : > { %v1041_v15 = vpop.permute.xlu1 %1040  ;;  %v917_v16 = vpack.c.bf16 %v572_v1, %v562_v12  ;;  %v920_v14 = vpack.c.bf16 %v573_v6, %v563_v13 }
 0x1fa   : > { %v1043_v17 = vunpack.i.h.bf16 %v1041_v15  ;;  %v1042_v18 = vunpack.i.l.bf16 %v1041_v15  ;;  %v592_v19 = vsel %vm1548_vm2, %v1032_v10, %v1033_v7  ;;  %v593_v20 = vsel %vm1549_vm10, %v1033_v7, %v1032_v10 }
 0x1fb   : > { %918 = vmatprep.subr.msk.bf16.mxu1 %vm1215_vm11, %v917_v16  ;;  %v1051_v21 = vpop.permute.xlu0 %1050  ;;  %vm1551_vm2 = vcmp.ge.s32.totalorder %v1175_v8, 16  ;;  %vm1552_vm10 = vcmp.lt.s32.totalorder %v1175_v8, 127 }
 0x1fc   : > { %v582_v22 = vsel %vm1545_vm8, %v1042_v18, %v1043_v17  ;;  %v583_v23 = vsel %vm1550_vm9, %v1043_v17, %v1042_v18  ;;  %v1053_v24 = vunpack.i.h.bf16 %v1051_v21  ;;  %v1052_v25 = vunpack.i.l.bf16 %v1051_v21  ;;  %921 = vmatpush1.bf16.msk.msra.mxu1 %vm1236_vm14, %v920_v14  ;;  %vm925_vm1 = vmpackc.low %vm1248_vm15, %vm1551_vm2  ;;  %v1085_v18 = vld [vmem:[%s1507_s3] sm:$0xff]  }
 0x1fd   : > { %v923_v26 = vpack.c.bf16 %v592_v19, %v582_v22  ;;  %v926_v27 = vpack.c.bf16 %v593_v20, %v583_v23  ;;  %v1046_v28 = vpop.permute.xlu1 %1045  ;;  %vm1553_vm8 = vcmp.lt.s32.totalorder %v1175_v8, 1  ;;  %vm1555_vm15 = vmmov %vm1552_vm10 }
 0x1fe   : > { %v1048_v29 = vunpack.i.h.bf16 %v1046_v28  ;;  %v1047_v31 = vunpack.i.l.bf16 %v1046_v28  ;;  %v617_v33 = vsel %vm1552_vm10, %v1053_v24, %v1052_v25  ;;  %vm1554_vm14 = vmmov %vm1553_vm8  ;;  %v616_v44 = vsel %vm1555_vm15, %v1052_v25, %v1053_v24 }
 0x1ff   : > { %924 = vmatprep.subr.msk.bf16.mxu1 %vm1278_vm6, %v923_v26  ;;  %v1061_v32 = vpop.permute.xlu0 %1060  ;;  %v935_v45 = vpack.c.bf16 %v617_v33, %v1381_v53  ;;  %vm1556_vm9 = vmmov %vm1553_vm8  ;;  %v938_v54 = vpack.c.bf16 %v616_v44, %v1378_v52 }
 0x200   : > { %v602_v36 = vsel %vm1553_vm8, %v1047_v31, %v1048_v29  ;;  %v603_v35 = vsel %vm1554_vm14, %v1048_v29, %v1047_v31  ;;  %927 = vmatpush1.bf16.msk.msra.mxu1 %vm925_vm1, %v926_v27  ;;  %v1063_v47 = vunpack.i.h.bf16 %v1061_v32  ;;  %v1062_v48 = vunpack.i.l.bf16 %v1061_v32  ;;  %vm1557_vm2 = vmmov %vm1553_vm8 }
 0x201   : > { %v929_v37 = vpack.c.bf16 %v1374_v51, %v602_v36  ;;  %v932_v43 = vpack.c.bf16 %v1371_v50, %v603_v35  ;;  %v1056_v38 = vpop.permute.xlu1 %1055  ;;  %vm1558_vm1 = vmmov %vm1552_vm10 }
 0x202   : > { %v1058_v40 = vunpack.i.h.bf16 %v1056_v38  ;;  %v1057_v42 = vunpack.i.l.bf16 %v1056_v38  ;;  %v641_v57 = vsel %vm1558_vm1, %v1063_v47, %v1062_v48  ;;  %vm1559_vm10 = vmmov %vm1558_vm1 }
 0x203   : > { %930 = vmatprep.subr.msk.bf16.mxu1 %vm1215_vm11, %v929_v37  ;;  %v1071_v50 = vpop.permute.xlu0 %1070  ;;  %v640_v2 = vsel %vm1559_vm10, %v1062_v48, %v1063_v47 }
 0x204   : > { %v626_v49 = vsel %vm1556_vm9, %v1057_v42, %v1058_v40  ;;  %933 = vmatpush1.bf16.msk.msra.mxu1 %vm1337_vm12, %v932_v43  ;;  %v627_v53 = vsel %vm1557_vm2, %v1058_v40, %v1057_v42  ;;  %v1073_v52 = vunpack.i.h.bf16 %v1071_v50  ;;  %v1072_v63 = vunpack.i.l.bf16 %v1071_v50 }
 0x205   : > { %v1066_v51 = vpop.permute.xlu1 %1065  ;;  %936 = vmatprep.subr.msk.bf16.mxu1 %vm1278_vm6, %v935_v45  ;;  %v941_v56 = vpack.c.bf16 %v1356_v39, %v626_v49  ;;  %v944_v62 = vpack.c.bf16 %v1353_v34, %v627_v53  ;;  %v947_v39 = vpack.c.bf16 %v641_v57, %v1364_v46  ;;  %v950_v30 = vpack.c.bf16 %v640_v2, %v1359_v41 }
 0x206   : > { %v1068_v58 = vunpack.i.h.bf16 %v1066_v51  ;;  %v1067_v60 = vunpack.i.l.bf16 %v1066_v51  ;;  %v661_v34 = vsel %vm391_vm5, %v1073_v52, %v1072_v63  ;;  %v660_v55 = vsel %vm391_vm5, %v1072_v63, %v1073_v52 }
 0x207   : > { %v1081_v3 = vpop.permute.xlu0 %1080 }
 0x208   : > { %939 = vmatpush1.bf16.msk.msra.mxu1 %vm1312_vm3, %v938_v54  ;;  %v651_v4 = vsel %vm374_vm13, %v1068_v58, %v1067_v60  ;;  %v1083_v7 = vunpack.i.h.bf16 %v1081_v3  ;;  %v1082_v10 = vunpack.i.l.bf16 %v1081_v3  ;;  %v650_v46 = vsel %vm374_vm13, %v1067_v60, %v1068_v58 }
 0x209   : > { %v1076_v61 = vpop.permute.xlu1 %1075  ;;  %942 = vmatprep.subr.msk.bf16.mxu1 %vm1215_vm11, %v941_v56  ;;  %v953_v12 = vpack.c.bf16 %v661_v34, %v651_v4  ;;  %v956_v41 = vpack.c.bf16 %v660_v55, %v650_v46 }
 0x20a   : > { %v1078_v1 = vunpack.i.h.bf16 %v1076_v61  ;;  %v1077_v6 = vunpack.i.l.bf16 %v1076_v61  ;;  %v681_v15 = vsel %vm406_vm4, %v1083_v7, %v1082_v10  ;;  %v680_v5 = vsel %vm406_vm4, %v1082_v10, %v1083_v7 }
 0x20c   : > { %945 = vmatpush1.bf16.msk.msra.mxu1 %vm1337_vm12, %v944_v62  ;;  %v671_v13 = vsel %vm391_vm5, %v1078_v1, %v1077_v6  ;;  %v670_v16 = vsel %vm391_vm5, %v1077_v6, %v1078_v1 }
 0x20d   : > { %948 = vmatprep.subr.msk.bf16.mxu1 %vm1278_vm6, %v947_v39  ;;  %vm1560_vm6 = vcmp.lt.s32.totalorder %v1178_v9, 240  ;;  %v959_v14 = vpack.c.bf16 %v681_v15, %v671_v13  ;;  %v962_v17 = vpack.c.bf16 %v680_v5, %v670_v16 }
 0x20e   : > { %vm958_vm11 = vmpackc.low %vm1286_vm7, %vm1560_vm6 }
 0x210   : > { %951 = vmatpush1.bf16.msk.msra.mxu1 %vm1312_vm3, %v950_v30 }
 0x211   : > { %954 = vmatprep.subr.msk.bf16.mxu1 %vm1320_vm0, %v953_v12 }
 0x214   : > { %957 = vmatpush1.bf16.msk.msra.mxu1 %vm1337_vm12, %v956_v41 }
 0x215   : > { %960 = vmatprep.subr.msk.bf16.mxu1 %vm958_vm11, %v959_v14 }
 0x218   : > { %963 = vmatpush1.bf16.msk.msra.mxu1 %vm1312_vm3, %v962_v17  ;;  %v746_v11 = vpop.permute.xlu0 %745 }
 0x21a   : > { %v741_v9 = vpop.permute.xlu1 %740 }
 0x21b   : > { %787 = vmatmul.mubr.bf16.vlgmr.msra.gmra.mrb[0].mxu1 %v1085_v18 }
 0x2ee   : > { %v788_v59 = vpop.f32.mrb[0].mxu1 }
 0x2ef   : > { %v789_v19 = vadd.f32 %v788_v59, %v741_v9  ;;  %v790_v20 = vpop.f32.mrb[1].mxu1 }
 0x2f0   : > { %v791_v8 = vadd.f32 %v790_v20, %v741_v9  ;;  %v792_v21 = vpop.f32.mrb[2].mxu1 }
 0x2f1   : > { %v797_v22 = vmax.f32 %v789_v19, 0.0  ;;  %v793_v23 = vadd.f32 %v792_v21, %v746_v11  ;;  %v794_v24 = vpop.f32.mrb[3].mxu1 }
 0x2f2   : > { %v798_v25 = vmax.f32 %v791_v8, 0.0  ;;  %v795_v26 = vadd.f32 %v794_v24, %v746_v11 }
 0x2f3   : > { %801 = vst [vmem:[%s271_s8] sm:$0xff] %v797_v22  ;;  %v799_v0 = vmax.f32 %v793_v23, 0.0 }
 0x2f4   : > { %802 = vst [vmem:[%s271_s8 + $0x8] sm:$0xff] %v798_v25  ;;  %v800_v27 = vmax.f32 %v795_v26, 0.0 }
 0x2f5   : > { %803 = vst [vmem:[%s271_s8 + $0x10] sm:$0xff] %v799_v0 }
 0x2f6   : > { %804 = vst [vmem:[%s271_s8 + $0x18] sm:$0xff] %v800_v27 }
 0x2f7 PF: > { %s16_s21 = sadd.s32 1, %s1092_s21  }
 0x2f8   : > { %p13_p4 = scmp.ge.s32.totalorder %s16_s21, 4  }
 0x2fa   :  { %15 = sbr.rel (!%p13_p4) target bundleno = 1 (0x1), region = 77 }

</bundles_post_ra>
